<compile_context>
chip_gen: v5e
topology: v5e:2x2
jax: 0.10.0
libtpu: 0.0.40
codegen_flags: <defaults>
</compile_context>

<pallas_src>
import functools

import jax
import jax.numpy as jnp
from jax.experimental import pallas as pl
from jax.experimental.pallas import tpu as pltpu


_VMEM_LIMIT = 32 * 1024 * 1024


def _gate_kernel(w_ref, x_ref, gate_ref, sum_ref, max_ref, *, ksize, c_total):
    # w_ref:    (2*ksize*ksize,) f32 in SMEM, flattened conv weight [1, 2, kh, kw]
    # x_ref:    (1, c_tile, H, W) block in VMEM
    # gate_ref: (1, H, W) f32 block in VMEM (only written at the last C tile)
    # sum_ref / max_ref: (H, W) f32 VMEM scratch, persistent across grid steps
    ci = pl.program_id(1)
    num_c = pl.num_programs(1)
    _, _, H, W = x_ref.shape
    pad = ksize // 2

    # ---- vectorized partial channel reduction over this C tile ----
    x = x_ref[0].astype(jnp.float32)          # (c_tile, H, W)
    part_sum = jnp.sum(x, axis=0)             # (H, W)
    part_max = jnp.max(x, axis=0)             # (H, W)

    @pl.when(ci == 0)
    def _init():
        sum_ref[...] = part_sum
        max_ref[...] = part_max

    @pl.when(ci > 0)
    def _accumulate():
        sum_ref[...] = sum_ref[...] + part_sum
        max_ref[...] = jnp.maximum(max_ref[...], part_max)

    # ---- last C tile: tiny 2->1 conv (zero padded shifts via roll) + sigmoid ----
    @pl.when(ci == num_c - 1)
    def _finalize():
        avg = sum_ref[...] * (1.0 / c_total)
        mx = max_ref[...]

        rows = jax.lax.broadcasted_iota(jnp.int32, (H, W), 0)
        cols = jax.lax.broadcasted_iota(jnp.int32, (H, W), 1)

        acc = jnp.zeros((H, W), jnp.float32)
        for c, s in enumerate((avg, mx)):
            for i in range(ksize):
                dh = i - pad
                # r[h, w] = s[h + dh, w] with zero padding (roll + border mask)
                r = s if dh == 0 else pltpu.roll(s, (-dh) % H, 0)
                if dh != 0:
                    r = jnp.where((rows + dh >= 0) & (rows + dh < H), r, 0.0)
                for j in range(ksize):
                    dw = j - pad
                    # t[h, w] = s[h + dh, w + dw] with zero padding
                    t = r if dw == 0 else pltpu.roll(r, (-dw) % W, 1)
                    if dw != 0:
                        t = jnp.where((cols + dw >= 0) & (cols + dw < W), t, 0.0)
                    acc = acc + w_ref[c * ksize * ksize + i * ksize + j] * t

        gate_ref[0] = jax.nn.sigmoid(acc)


def _apply_kernel(gate_ref, x_ref, o_ref):
    # gate_ref: (1, 1, H*W) f32; x_ref / o_ref: (1, c_tile, H*W) in x dtype.
    # Multiply in the input dtype (bf16 VALU on v6e/v7x when x is bf16); for
    # f32 inputs this is exact f32 math.
    g = gate_ref[...].astype(x_ref.dtype)
    o_ref[...] = (x_ref[...] * g).astype(o_ref.dtype)


def _choose_c_tile(C, H, W, itemsize, budget_bytes=4 * 1024 * 1024):
    """Largest channel tile that (a) divides C, (b) is C or a multiple of 8
    (sublane tiling for the lane-dense apply pass), and (c) keeps one x block
    within budget so double-buffered in+out blocks stay well under VMEM."""
    per_c = max(1, H * W * itemsize)
    if C * per_c <= budget_bytes:
        return C
    best = C if C % 8 != 0 else 8     # fall back to whole C if it cannot tile
    for d in range(8, C + 1, 8):
        if C % d == 0 and d * per_c <= budget_bytes:
            best = d
    return best


def spatial_attention(x, weight, *, ksize=3, c_tile=None):
    """x: (N, C, H, W); weight: (1, 2, ksize, ksize) conv weight (no bias)."""
    N, C, H, W = x.shape
    assert weight.shape == (1, 2, ksize, ksize)
    w_flat = weight.reshape(-1).astype(jnp.float32)   # order [o=0, c, kh, kw]

    if c_tile is None:
        c_tile = _choose_c_tile(C, H, W, jnp.dtype(x.dtype).itemsize)
    assert C % c_tile == 0 and (c_tile == C or c_tile % 8 == 0), c_tile
    num_c = C // c_tile

    # ---- pass 1: channel mean/max -> 3x3 conv -> sigmoid gate (N, H, W) ----
    gate = pl.pallas_call(
        functools.partial(_gate_kernel, ksize=ksize, c_total=C),
        out_shape=jax.ShapeDtypeStruct((N, H, W), jnp.float32),
        grid=(N, num_c),
        in_specs=[
            pl.BlockSpec(memory_space=pltpu.MemorySpace.SMEM),        # conv weight
            pl.BlockSpec((1, c_tile, H, W), lambda b, c: (b, c, 0, 0)),
        ],
        out_specs=pl.BlockSpec((1, H, W), lambda b, c: (b, 0, 0)),
        scratch_shapes=[pltpu.VMEM((H, W), jnp.float32),
                        pltpu.VMEM((H, W), jnp.float32)],
        compiler_params=pltpu.CompilerParams(
            dimension_semantics=("parallel", "arbitrary"),
            vmem_limit_bytes=_VMEM_LIMIT),
    )(w_flat, x)

    # ---- pass 2: lane-dense gated multiply over (N, C, H*W) ----
    HW = H * W
    x_flat = x.reshape(N, C, HW)
    gate_flat = gate.reshape(N, 1, HW)
    out_flat = pl.pallas_call(
        _apply_kernel,
        out_shape=jax.ShapeDtypeStruct((N, C, HW), x.dtype),
        grid=(N, num_c),
        in_specs=[
            pl.BlockSpec((1, 1, HW), lambda b, c: (b, 0, 0)),
            pl.BlockSpec((1, c_tile, HW), lambda b, c: (b, c, 0)),
        ],
        out_specs=pl.BlockSpec((1, c_tile, HW), lambda b, c: (b, c, 0)),
        compiler_params=pltpu.CompilerParams(
            dimension_semantics=("parallel", "parallel"),
            vmem_limit_bytes=_VMEM_LIMIT),
    )(gate_flat, x_flat)
    return out_flat.reshape(N, C, H, W)


def _reference(x, weight):
    avg = jnp.mean(x, axis=1, keepdims=True)
    mx = jnp.max(x, axis=1, keepdims=True)
    scale = jnp.concatenate([avg, mx], axis=1)
    conv = jax.lax.conv_general_dilated(
        scale, weight, window_strides=(1, 1), padding="SAME",
        dimension_numbers=("NCHW", "OIHW", "NCHW"),
        precision=jax.lax.Precision.HIGHEST)
    return x * jax.nn.sigmoid(conv)


if __name__ == "__main__":
    key = jax.random.PRNGKey(0)
    wkey, xkey = jax.random.split(key)
    ksize = 3

    # c2_msra_fill: kaiming_normal, fan_out = out_channels * k * k = 9
    std = (2.0 / (1 * ksize * ksize)) ** 0.5
    weight = jax.random.normal(wkey, (1, 2, ksize, ksize), jnp.float32) * std

    # Main small config (single C tile).
    N, C, H, W = 2, 4, 16, 16
    x = jax.random.normal(xkey, (N, C, H, W), jnp.float32)
    out = jax.block_until_ready(spatial_attention(x, weight, ksize=ksize))
    ref = _reference(x, weight)
    assert out.shape == ref.shape and out.dtype == ref.dtype
    assert jnp.allclose(out, ref, rtol=1e-4, atol=1e-4), "mismatch (single-tile path)"

    # Also exercise the channel-tiled reduction / apply path (C=16, c_tile=8).
    x2 = jax.random.normal(jax.random.PRNGKey(1), (2, 16, 16, 16), jnp.float32)
    out2 = jax.block_until_ready(spatial_attention(x2, weight, ksize=ksize, c_tile=8))
    ref2 = _reference(x2, weight)
    assert jnp.allclose(out2, ref2, rtol=1e-4, atol=1e-4), "mismatch (C-tiled path)"

    print("KERNEL_OK")
</pallas_src>

<mosaic_0001>
module attributes {stable_mosaic.version = 11 : i64} {
  func.func @_gate_kernel(%arg0: i32, %arg1: i32, %arg2: memref<18xf32, #tpu.memory_space<smem>>, %arg3: memref<1x4x16x16xf32, #tpu.memory_space<vmem>>, %arg4: memref<1x16x16xf32, #tpu.memory_space<vmem>>, %arg5: memref<16x16xf32, #tpu.memory_space<vmem>>, %arg6: memref<16x16xf32, #tpu.memory_space<vmem>>) attributes {dimension_semantics = [#tpu.dimension_semantics<parallel>, #tpu.dimension_semantics<arbitrary>], iteration_bounds = array<i64: 2, 1>, scalar_prefetch = 0 : i64, scratch_operands = 2 : i64, tpu.core_type = #tpu.core_type<tc>, window_params = [{transform_indices = @transform_0, window_bounds = array<i64: 18>}, {transform_indices = @transform_1, window_bounds = array<i64: 1, 4, 16, 16>}, {transform_indices = @transform_2, window_bounds = array<i64: 1, 16, 16>}]} {
    %c0 = arith.constant 0 : index
    %c0_0 = arith.constant 0 : index
    %c0_1 = arith.constant 0 : index
    %c0_2 = arith.constant 0 : index
    %0 = vector.load %arg3[%c0, %c0_0, %c0_1, %c0_2] : memref<1x4x16x16xf32, #tpu.memory_space<vmem>>, vector<1x4x16x16xf32>
    %1 = vector.shape_cast %0 : vector<1x4x16x16xf32> to vector<4x16x16xf32>
    %cst = arith.constant dense<0.000000e+00> : vector<16x16xf32>
    %2 = vector.multi_reduction <add>, %1, %cst [0] : vector<4x16x16xf32> to vector<16x16xf32>
    %cst_3 = arith.constant dense<0xFF800000> : vector<16x16xf32>
    %3 = vector.multi_reduction <maximumf>, %1, %cst_3 [0] : vector<4x16x16xf32> to vector<16x16xf32>
    %c0_i32 = arith.constant 0 : i32
    %4 = arith.cmpi eq, %arg1, %c0_i32 : i32
    %5 = arith.extui %4 : i1 to i32
    %c0_i32_4 = arith.constant 0 : i32
    %6 = arith.cmpi ne, %5, %c0_i32_4 : i32
    scf.if %6 {
      %c0_9 = arith.constant 0 : index
      %c0_10 = arith.constant 0 : index
      %13 = vector.load %arg5[%c0_9, %c0_10] : memref<16x16xf32, #tpu.memory_space<vmem>>, vector<16x16xf32>
      tpu.vector_store %arg5[%c0_9, %c0_10], %2 {strides = array<i32>} : memref<16x16xf32, #tpu.memory_space<vmem>>, vector<16x16xf32>,
      %c0_11 = arith.constant 0 : index
      %c0_12 = arith.constant 0 : index
      %14 = vector.load %arg6[%c0_11, %c0_12] : memref<16x16xf32, #tpu.memory_space<vmem>>, vector<16x16xf32>
      tpu.vector_store %arg6[%c0_11, %c0_12], %3 {strides = array<i32>} : memref<16x16xf32, #tpu.memory_space<vmem>>, vector<16x16xf32>,
    } else {
    }
    %c0_i32_5 = arith.constant 0 : i32
    %7 = arith.cmpi sgt, %arg1, %c0_i32_5 : i32
    %8 = arith.extui %7 : i1 to i32
    %c0_i32_6 = arith.constant 0 : i32
    %9 = arith.cmpi ne, %8, %c0_i32_6 : i32
    scf.if %9 {
      %c0_9 = arith.constant 0 : index
      %c0_10 = arith.constant 0 : index
      %13 = vector.load %arg5[%c0_9, %c0_10] : memref<16x16xf32, #tpu.memory_space<vmem>>, vector<16x16xf32>
      %14 = arith.addf %13, %2 : vector<16x16xf32>
      %c0_11 = arith.constant 0 : index
      %c0_12 = arith.constant 0 : index
      %15 = vector.load %arg5[%c0_11, %c0_12] : memref<16x16xf32, #tpu.memory_space<vmem>>, vector<16x16xf32>
      tpu.vector_store %arg5[%c0_11, %c0_12], %14 {strides = array<i32>} : memref<16x16xf32, #tpu.memory_space<vmem>>, vector<16x16xf32>,
      %c0_13 = arith.constant 0 : index
      %c0_14 = arith.constant 0 : index
      %16 = vector.load %arg6[%c0_13, %c0_14] : memref<16x16xf32, #tpu.memory_space<vmem>>, vector<16x16xf32>
      %17 = arith.maximumf %16, %3 : vector<16x16xf32>
      %c0_15 = arith.constant 0 : index
      %c0_16 = arith.constant 0 : index
      %18 = vector.load %arg6[%c0_15, %c0_16] : memref<16x16xf32, #tpu.memory_space<vmem>>, vector<16x16xf32>
      tpu.vector_store %arg6[%c0_15, %c0_16], %17 {strides = array<i32>} : memref<16x16xf32, #tpu.memory_space<vmem>>, vector<16x16xf32>,
    } else {
    }
    %c0_i32_7 = arith.constant 0 : i32
    %10 = arith.cmpi eq, %arg1, %c0_i32_7 : i32
    %11 = arith.extui %10 : i1 to i32
    %c0_i32_8 = arith.constant 0 : i32
    %12 = arith.cmpi ne, %11, %c0_i32_8 : i32
    scf.if %12 {
      %c0_9 = arith.constant 0 : index
      %c0_10 = arith.constant 0 : index
      %13 = vector.load %arg5[%c0_9, %c0_10] : memref<16x16xf32, #tpu.memory_space<vmem>>, vector<16x16xf32>
      %cst_11 = arith.constant 2.500000e-01 : f32
      %14 = vector.broadcast %cst_11 : f32 to vector<16x16xf32>
      %15 = arith.mulf %13, %14 : vector<16x16xf32>
      %c0_12 = arith.constant 0 : index
      %c0_13 = arith.constant 0 : index
      %16 = vector.load %arg6[%c0_12, %c0_13] : memref<16x16xf32, #tpu.memory_space<vmem>>, vector<16x16xf32>
      %17 = tpu.iota {dimensions = array<i32: 0>} : vector<16x16xi32>
      %18 = tpu.iota {dimensions = array<i32: 1>} : vector<16x16xi32>
      %cst_14 = arith.constant 0.000000e+00 : f32
      %19 = vector.broadcast %cst_14 : f32 to vector<16x16xf32>
      %c1_i32 = arith.constant 1 : i32
      %20 = tpu.dynamic_rotate %15 by %c1_i32 dim 0 : vector<16x16xf32>, i32 -> vector<16x16xf32>
      %c-1_i32 = arith.constant -1 : i32
      %21 = vector.broadcast %c-1_i32 : i32 to vector<16x16xi32>
      %22 = arith.addi %17, %21 : vector<16x16xi32>
      %c0_i32_15 = arith.constant 0 : i32
      %23 = vector.broadcast %c0_i32_15 : i32 to vector<16x16xi32>
      %24 = arith.cmpi sge, %22, %23 : vector<16x16xi32>
      %c-1_i32_16 = arith.constant -1 : i32
      %25 = vector.broadcast %c-1_i32_16 : i32 to vector<16x16xi32>
      %26 = arith.addi %17, %25 : vector<16x16xi32>
      %c16_i32 = arith.constant 16 : i32
      %27 = vector.broadcast %c16_i32 : i32 to vector<16x16xi32>
      %28 = arith.cmpi slt, %26, %27 : vector<16x16xi32>
      %29 = arith.andi %24, %28 : vector<16x16xi1>
      %cst_17 = arith.constant 0.000000e+00 : f32
      %30 = vector.broadcast %cst_17 : f32 to vector<16x16xf32>
      %31 = arith.select %29, %20, %30 : vector<16x16xi1>, vector<16x16xf32>
      %c1_i32_18 = arith.constant 1 : i32
      %32 = tpu.dynamic_rotate %31 by %c1_i32_18 dim 1 : vector<16x16xf32>, i32 -> vector<16x16xf32>
      %c-1_i32_19 = arith.constant -1 : i32
      %33 = vector.broadcast %c-1_i32_19 : i32 to vector<16x16xi32>
      %34 = arith.addi %18, %33 : vector<16x16xi32>
      %c0_i32_20 = arith.constant 0 : i32
      %35 = vector.broadcast %c0_i32_20 : i32 to vector<16x16xi32>
      %36 = arith.cmpi sge, %34, %35 : vector<16x16xi32>
      %c-1_i32_21 = arith.constant -1 : i32
      %37 = vector.broadcast %c-1_i32_21 : i32 to vector<16x16xi32>
      %38 = arith.addi %18, %37 : vector<16x16xi32>
      %c16_i32_22 = arith.constant 16 : i32
      %39 = vector.broadcast %c16_i32_22 : i32 to vector<16x16xi32>
      %40 = arith.cmpi slt, %38, %39 : vector<16x16xi32>
      %41 = arith.andi %36, %40 : vector<16x16xi1>
      %cst_23 = arith.constant 0.000000e+00 : f32
      %42 = vector.broadcast %cst_23 : f32 to vector<16x16xf32>
      %43 = arith.select %41, %32, %42 : vector<16x16xi1>, vector<16x16xf32>
      %c0_24 = arith.constant 0 : index
      %44 = memref.load %arg2[%c0_24] : memref<18xf32, #tpu.memory_space<smem>>
      %45 = vector.broadcast %44 : f32 to vector<16x16xf32>
      %46 = arith.mulf %45, %43 : vector<16x16xf32>
      %47 = arith.addf %19, %46 : vector<16x16xf32>
      %c1 = arith.constant 1 : index
      %48 = memref.load %arg2[%c1] : memref<18xf32, #tpu.memory_space<smem>>
      %49 = vector.broadcast %48 : f32 to vector<16x16xf32>
      %50 = arith.mulf %49, %31 : vector<16x16xf32>
      %51 = arith.addf %47, %50 : vector<16x16xf32>
      %c15_i32 = arith.constant 15 : i32
      %52 = tpu.dynamic_rotate %31 by %c15_i32 dim 1 : vector<16x16xf32>, i32 -> vector<16x16xf32>
      %c1_i32_25 = arith.constant 1 : i32
      %53 = vector.broadcast %c1_i32_25 : i32 to vector<16x16xi32>
      %54 = arith.addi %18, %53 : vector<16x16xi32>
      %c0_i32_26 = arith.constant 0 : i32
      %55 = vector.broadcast %c0_i32_26 : i32 to vector<16x16xi32>
      %56 = arith.cmpi sge, %54, %55 : vector<16x16xi32>
      %c1_i32_27 = arith.constant 1 : i32
      %57 = vector.broadcast %c1_i32_27 : i32 to vector<16x16xi32>
      %58 = arith.addi %18, %57 : vector<16x16xi32>
      %c16_i32_28 = arith.constant 16 : i32
      %59 = vector.broadcast %c16_i32_28 : i32 to vector<16x16xi32>
      %60 = arith.cmpi slt, %58, %59 : vector<16x16xi32>
      %61 = arith.andi %56, %60 : vector<16x16xi1>
      %cst_29 = arith.constant 0.000000e+00 : f32
      %62 = vector.broadcast %cst_29 : f32 to vector<16x16xf32>
      %63 = arith.select %61, %52, %62 : vector<16x16xi1>, vector<16x16xf32>
      %c2 = arith.constant 2 : index
      %64 = memref.load %arg2[%c2] : memref<18xf32, #tpu.memory_space<smem>>
      %65 = vector.broadcast %64 : f32 to vector<16x16xf32>
      %66 = arith.mulf %65, %63 : vector<16x16xf32>
      %67 = arith.addf %51, %66 : vector<16x16xf32>
      %c1_i32_30 = arith.constant 1 : i32
      %68 = tpu.dynamic_rotate %15 by %c1_i32_30 dim 1 : vector<16x16xf32>, i32 -> vector<16x16xf32>
      %c-1_i32_31 = arith.constant -1 : i32
      %69 = vector.broadcast %c-1_i32_31 : i32 to vector<16x16xi32>
      %70 = arith.addi %18, %69 : vector<16x16xi32>
      %c0_i32_32 = arith.constant 0 : i32
      %71 = vector.broadcast %c0_i32_32 : i32 to vector<16x16xi32>
      %72 = arith.cmpi sge, %70, %71 : vector<16x16xi32>
      %c-1_i32_33 = arith.constant -1 : i32
      %73 = vector.broadcast %c-1_i32_33 : i32 to vector<16x16xi32>
      %74 = arith.addi %18, %73 : vector<16x16xi32>
      %c16_i32_34 = arith.constant 16 : i32
      %75 = vector.broadcast %c16_i32_34 : i32 to vector<16x16xi32>
      %76 = arith.cmpi slt, %74, %75 : vector<16x16xi32>
      %77 = arith.andi %72, %76 : vector<16x16xi1>
      %cst_35 = arith.constant 0.000000e+00 : f32
      %78 = vector.broadcast %cst_35 : f32 to vector<16x16xf32>
      %79 = arith.select %77, %68, %78 : vector<16x16xi1>, vector<16x16xf32>
      %c3 = arith.constant 3 : index
      %80 = memref.load %arg2[%c3] : memref<18xf32, #tpu.memory_space<smem>>
      %81 = vector.broadcast %80 : f32 to vector<16x16xf32>
      %82 = arith.mulf %81, %79 : vector<16x16xf32>
      %83 = arith.addf %67, %82 : vector<16x16xf32>
      %c4 = arith.constant 4 : index
      %84 = memref.load %arg2[%c4] : memref<18xf32, #tpu.memory_space<smem>>
      %85 = vector.broadcast %84 : f32 to vector<16x16xf32>
      %86 = arith.mulf %85, %15 : vector<16x16xf32>
      %87 = arith.addf %83, %86 : vector<16x16xf32>
      %c15_i32_36 = arith.constant 15 : i32
      %88 = tpu.dynamic_rotate %15 by %c15_i32_36 dim 1 : vector<16x16xf32>, i32 -> vector<16x16xf32>
      %c1_i32_37 = arith.constant 1 : i32
      %89 = vector.broadcast %c1_i32_37 : i32 to vector<16x16xi32>
      %90 = arith.addi %18, %89 : vector<16x16xi32>
      %c0_i32_38 = arith.constant 0 : i32
      %91 = vector.broadcast %c0_i32_38 : i32 to vector<16x16xi32>
      %92 = arith.cmpi sge, %90, %91 : vector<16x16xi32>
      %c1_i32_39 = arith.constant 1 : i32
      %93 = vector.broadcast %c1_i32_39 : i32 to vector<16x16xi32>
      %94 = arith.addi %18, %93 : vector<16x16xi32>
      %c16_i32_40 = arith.constant 16 : i32
      %95 = vector.broadcast %c16_i32_40 : i32 to vector<16x16xi32>
      %96 = arith.cmpi slt, %94, %95 : vector<16x16xi32>
      %97 = arith.andi %92, %96 : vector<16x16xi1>
      %cst_41 = arith.constant 0.000000e+00 : f32
      %98 = vector.broadcast %cst_41 : f32 to vector<16x16xf32>
      %99 = arith.select %97, %88, %98 : vector<16x16xi1>, vector<16x16xf32>
      %c5 = arith.constant 5 : index
      %100 = memref.load %arg2[%c5] : memref<18xf32, #tpu.memory_space<smem>>
      %101 = vector.broadcast %100 : f32 to vector<16x16xf32>
      %102 = arith.mulf %101, %99 : vector<16x16xf32>
      %103 = arith.addf %87, %102 : vector<16x16xf32>
      %c15_i32_42 = arith.constant 15 : i32
      %104 = tpu.dynamic_rotate %15 by %c15_i32_42 dim 0 : vector<16x16xf32>, i32 -> vector<16x16xf32>
      %c1_i32_43 = arith.constant 1 : i32
      %105 = vector.broadcast %c1_i32_43 : i32 to vector<16x16xi32>
      %106 = arith.addi %17, %105 : vector<16x16xi32>
      %c0_i32_44 = arith.constant 0 : i32
      %107 = vector.broadcast %c0_i32_44 : i32 to vector<16x16xi32>
      %108 = arith.cmpi sge, %106, %107 : vector<16x16xi32>
      %c1_i32_45 = arith.constant 1 : i32
      %109 = vector.broadcast %c1_i32_45 : i32 to vector<16x16xi32>
      %110 = arith.addi %17, %109 : vector<16x16xi32>
      %c16_i32_46 = arith.constant 16 : i32
      %111 = vector.broadcast %c16_i32_46 : i32 to vector<16x16xi32>
      %112 = arith.cmpi slt, %110, %111 : vector<16x16xi32>
      %113 = arith.andi %108, %112 : vector<16x16xi1>
      %cst_47 = arith.constant 0.000000e+00 : f32
      %114 = vector.broadcast %cst_47 : f32 to vector<16x16xf32>
      %115 = arith.select %113, %104, %114 : vector<16x16xi1>, vector<16x16xf32>
      %c1_i32_48 = arith.constant 1 : i32
      %116 = tpu.dynamic_rotate %115 by %c1_i32_48 dim 1 : vector<16x16xf32>, i32 -> vector<16x16xf32>
      %c-1_i32_49 = arith.constant -1 : i32
      %117 = vector.broadcast %c-1_i32_49 : i32 to vector<16x16xi32>
      %118 = arith.addi %18, %117 : vector<16x16xi32>
      %c0_i32_50 = arith.constant 0 : i32
      %119 = vector.broadcast %c0_i32_50 : i32 to vector<16x16xi32>
      %120 = arith.cmpi sge, %118, %119 : vector<16x16xi32>
      %c-1_i32_51 = arith.constant -1 : i32
      %121 = vector.broadcast %c-1_i32_51 : i32 to vector<16x16xi32>
      %122 = arith.addi %18, %121 : vector<16x16xi32>
      %c16_i32_52 = arith.constant 16 : i32
      %123 = vector.broadcast %c16_i32_52 : i32 to vector<16x16xi32>
      %124 = arith.cmpi slt, %122, %123 : vector<16x16xi32>
      %125 = arith.andi %120, %124 : vector<16x16xi1>
      %cst_53 = arith.constant 0.000000e+00 : f32
      %126 = vector.broadcast %cst_53 : f32 to vector<16x16xf32>
      %127 = arith.select %125, %116, %126 : vector<16x16xi1>, vector<16x16xf32>
      %c6 = arith.constant 6 : index
      %128 = memref.load %arg2[%c6] : memref<18xf32, #tpu.memory_space<smem>>
      %129 = vector.broadcast %128 : f32 to vector<16x16xf32>
      %130 = arith.mulf %129, %127 : vector<16x16xf32>
      %131 = arith.addf %103, %130 : vector<16x16xf32>
      %c7 = arith.constant 7 : index
      %132 = memref.load %arg2[%c7] : memref<18xf32, #tpu.memory_space<smem>>
      %133 = vector.broadcast %132 : f32 to vector<16x16xf32>
      %134 = arith.mulf %133, %115 : vector<16x16xf32>
      %135 = arith.addf %131, %134 : vector<16x16xf32>
      %c15_i32_54 = arith.constant 15 : i32
      %136 = tpu.dynamic_rotate %115 by %c15_i32_54 dim 1 : vector<16x16xf32>, i32 -> vector<16x16xf32>
      %c1_i32_55 = arith.constant 1 : i32
      %137 = vector.broadcast %c1_i32_55 : i32 to vector<16x16xi32>
      %138 = arith.addi %18, %137 : vector<16x16xi32>
      %c0_i32_56 = arith.constant 0 : i32
      %139 = vector.broadcast %c0_i32_56 : i32 to vector<16x16xi32>
      %140 = arith.cmpi sge, %138, %139 : vector<16x16xi32>
      %c1_i32_57 = arith.constant 1 : i32
      %141 = vector.broadcast %c1_i32_57 : i32 to vector<16x16xi32>
      %142 = arith.addi %18, %141 : vector<16x16xi32>
      %c16_i32_58 = arith.constant 16 : i32
      %143 = vector.broadcast %c16_i32_58 : i32 to vector<16x16xi32>
      %144 = arith.cmpi slt, %142, %143 : vector<16x16xi32>
      %145 = arith.andi %140, %144 : vector<16x16xi1>
      %cst_59 = arith.constant 0.000000e+00 : f32
      %146 = vector.broadcast %cst_59 : f32 to vector<16x16xf32>
      %147 = arith.select %145, %136, %146 : vector<16x16xi1>, vector<16x16xf32>
      %c8 = arith.constant 8 : index
      %148 = memref.load %arg2[%c8] : memref<18xf32, #tpu.memory_space<smem>>
      %149 = vector.broadcast %148 : f32 to vector<16x16xf32>
      %150 = arith.mulf %149, %147 : vector<16x16xf32>
      %151 = arith.addf %135, %150 : vector<16x16xf32>
      %c1_i32_60 = arith.constant 1 : i32
      %152 = tpu.dynamic_rotate %16 by %c1_i32_60 dim 0 : vector<16x16xf32>, i32 -> vector<16x16xf32>
      %c-1_i32_61 = arith.constant -1 : i32
      %153 = vector.broadcast %c-1_i32_61 : i32 to vector<16x16xi32>
      %154 = arith.addi %17, %153 : vector<16x16xi32>
      %c0_i32_62 = arith.constant 0 : i32
      %155 = vector.broadcast %c0_i32_62 : i32 to vector<16x16xi32>
      %156 = arith.cmpi sge, %154, %155 : vector<16x16xi32>
      %c-1_i32_63 = arith.constant -1 : i32
      %157 = vector.broadcast %c-1_i32_63 : i32 to vector<16x16xi32>
      %158 = arith.addi %17, %157 : vector<16x16xi32>
      %c16_i32_64 = arith.constant 16 : i32
      %159 = vector.broadcast %c16_i32_64 : i32 to vector<16x16xi32>
      %160 = arith.cmpi slt, %158, %159 : vector<16x16xi32>
      %161 = arith.andi %156, %160 : vector<16x16xi1>
      %cst_65 = arith.constant 0.000000e+00 : f32
      %162 = vector.broadcast %cst_65 : f32 to vector<16x16xf32>
      %163 = arith.select %161, %152, %162 : vector<16x16xi1>, vector<16x16xf32>
      %c1_i32_66 = arith.constant 1 : i32
      %164 = tpu.dynamic_rotate %163 by %c1_i32_66 dim 1 : vector<16x16xf32>, i32 -> vector<16x16xf32>
      %c-1_i32_67 = arith.constant -1 : i32
      %165 = vector.broadcast %c-1_i32_67 : i32 to vector<16x16xi32>
      %166 = arith.addi %18, %165 : vector<16x16xi32>
      %c0_i32_68 = arith.constant 0 : i32
      %167 = vector.broadcast %c0_i32_68 : i32 to vector<16x16xi32>
      %168 = arith.cmpi sge, %166, %167 : vector<16x16xi32>
      %c-1_i32_69 = arith.constant -1 : i32
      %169 = vector.broadcast %c-1_i32_69 : i32 to vector<16x16xi32>
      %170 = arith.addi %18, %169 : vector<16x16xi32>
      %c16_i32_70 = arith.constant 16 : i32
      %171 = vector.broadcast %c16_i32_70 : i32 to vector<16x16xi32>
      %172 = arith.cmpi slt, %170, %171 : vector<16x16xi32>
      %173 = arith.andi %168, %172 : vector<16x16xi1>
      %cst_71 = arith.constant 0.000000e+00 : f32
      %174 = vector.broadcast %cst_71 : f32 to vector<16x16xf32>
      %175 = arith.select %173, %164, %174 : vector<16x16xi1>, vector<16x16xf32>
      %c9 = arith.constant 9 : index
      %176 = memref.load %arg2[%c9] : memref<18xf32, #tpu.memory_space<smem>>
      %177 = vector.broadcast %176 : f32 to vector<16x16xf32>
      %178 = arith.mulf %177, %175 : vector<16x16xf32>
      %179 = arith.addf %151, %178 : vector<16x16xf32>
      %c10 = arith.constant 10 : index
      %180 = memref.load %arg2[%c10] : memref<18xf32, #tpu.memory_space<smem>>
      %181 = vector.broadcast %180 : f32 to vector<16x16xf32>
      %182 = arith.mulf %181, %163 : vector<16x16xf32>
      %183 = arith.addf %179, %182 : vector<16x16xf32>
      %c15_i32_72 = arith.constant 15 : i32
      %184 = tpu.dynamic_rotate %163 by %c15_i32_72 dim 1 : vector<16x16xf32>, i32 -> vector<16x16xf32>
      %c1_i32_73 = arith.constant 1 : i32
      %185 = vector.broadcast %c1_i32_73 : i32 to vector<16x16xi32>
      %186 = arith.addi %18, %185 : vector<16x16xi32>
      %c0_i32_74 = arith.constant 0 : i32
      %187 = vector.broadcast %c0_i32_74 : i32 to vector<16x16xi32>
      %188 = arith.cmpi sge, %186, %187 : vector<16x16xi32>
      %c1_i32_75 = arith.constant 1 : i32
      %189 = vector.broadcast %c1_i32_75 : i32 to vector<16x16xi32>
      %190 = arith.addi %18, %189 : vector<16x16xi32>
      %c16_i32_76 = arith.constant 16 : i32
      %191 = vector.broadcast %c16_i32_76 : i32 to vector<16x16xi32>
      %192 = arith.cmpi slt, %190, %191 : vector<16x16xi32>
      %193 = arith.andi %188, %192 : vector<16x16xi1>
      %cst_77 = arith.constant 0.000000e+00 : f32
      %194 = vector.broadcast %cst_77 : f32 to vector<16x16xf32>
      %195 = arith.select %193, %184, %194 : vector<16x16xi1>, vector<16x16xf32>
      %c11 = arith.constant 11 : index
      %196 = memref.load %arg2[%c11] : memref<18xf32, #tpu.memory_space<smem>>
      %197 = vector.broadcast %196 : f32 to vector<16x16xf32>
      %198 = arith.mulf %197, %195 : vector<16x16xf32>
      %199 = arith.addf %183, %198 : vector<16x16xf32>
      %c1_i32_78 = arith.constant 1 : i32
      %200 = tpu.dynamic_rotate %16 by %c1_i32_78 dim 1 : vector<16x16xf32>, i32 -> vector<16x16xf32>
      %c-1_i32_79 = arith.constant -1 : i32
      %201 = vector.broadcast %c-1_i32_79 : i32 to vector<16x16xi32>
      %202 = arith.addi %18, %201 : vector<16x16xi32>
      %c0_i32_80 = arith.constant 0 : i32
      %203 = vector.broadcast %c0_i32_80 : i32 to vector<16x16xi32>
      %204 = arith.cmpi sge, %202, %203 : vector<16x16xi32>
      %c-1_i32_81 = arith.constant -1 : i32
      %205 = vector.broadcast %c-1_i32_81 : i32 to vector<16x16xi32>
      %206 = arith.addi %18, %205 : vector<16x16xi32>
      %c16_i32_82 = arith.constant 16 : i32
      %207 = vector.broadcast %c16_i32_82 : i32 to vector<16x16xi32>
      %208 = arith.cmpi slt, %206, %207 : vector<16x16xi32>
      %209 = arith.andi %204, %208 : vector<16x16xi1>
      %cst_83 = arith.constant 0.000000e+00 : f32
      %210 = vector.broadcast %cst_83 : f32 to vector<16x16xf32>
      %211 = arith.select %209, %200, %210 : vector<16x16xi1>, vector<16x16xf32>
      %c12 = arith.constant 12 : index
      %212 = memref.load %arg2[%c12] : memref<18xf32, #tpu.memory_space<smem>>
      %213 = vector.broadcast %212 : f32 to vector<16x16xf32>
      %214 = arith.mulf %213, %211 : vector<16x16xf32>
      %215 = arith.addf %199, %214 : vector<16x16xf32>
      %c13 = arith.constant 13 : index
      %216 = memref.load %arg2[%c13] : memref<18xf32, #tpu.memory_space<smem>>
      %217 = vector.broadcast %216 : f32 to vector<16x16xf32>
      %218 = arith.mulf %217, %16 : vector<16x16xf32>
      %219 = arith.addf %215, %218 : vector<16x16xf32>
      %c15_i32_84 = arith.constant 15 : i32
      %220 = tpu.dynamic_rotate %16 by %c15_i32_84 dim 1 : vector<16x16xf32>, i32 -> vector<16x16xf32>
      %c1_i32_85 = arith.constant 1 : i32
      %221 = vector.broadcast %c1_i32_85 : i32 to vector<16x16xi32>
      %222 = arith.addi %18, %221 : vector<16x16xi32>
      %c0_i32_86 = arith.constant 0 : i32
      %223 = vector.broadcast %c0_i32_86 : i32 to vector<16x16xi32>
      %224 = arith.cmpi sge, %222, %223 : vector<16x16xi32>
      %c1_i32_87 = arith.constant 1 : i32
      %225 = vector.broadcast %c1_i32_87 : i32 to vector<16x16xi32>
      %226 = arith.addi %18, %225 : vector<16x16xi32>
      %c16_i32_88 = arith.constant 16 : i32
      %227 = vector.broadcast %c16_i32_88 : i32 to vector<16x16xi32>
      %228 = arith.cmpi slt, %226, %227 : vector<16x16xi32>
      %229 = arith.andi %224, %228 : vector<16x16xi1>
      %cst_89 = arith.constant 0.000000e+00 : f32
      %230 = vector.broadcast %cst_89 : f32 to vector<16x16xf32>
      %231 = arith.select %229, %220, %230 : vector<16x16xi1>, vector<16x16xf32>
      %c14 = arith.constant 14 : index
      %232 = memref.load %arg2[%c14] : memref<18xf32, #tpu.memory_space<smem>>
      %233 = vector.broadcast %232 : f32 to vector<16x16xf32>
      %234 = arith.mulf %233, %231 : vector<16x16xf32>
      %235 = arith.addf %219, %234 : vector<16x16xf32>
      %c15_i32_90 = arith.constant 15 : i32
      %236 = tpu.dynamic_rotate %16 by %c15_i32_90 dim 0 : vector<16x16xf32>, i32 -> vector<16x16xf32>
      %c1_i32_91 = arith.constant 1 : i32
      %237 = vector.broadcast %c1_i32_91 : i32 to vector<16x16xi32>
      %238 = arith.addi %17, %237 : vector<16x16xi32>
      %c0_i32_92 = arith.constant 0 : i32
      %239 = vector.broadcast %c0_i32_92 : i32 to vector<16x16xi32>
      %240 = arith.cmpi sge, %238, %239 : vector<16x16xi32>
      %c1_i32_93 = arith.constant 1 : i32
      %241 = vector.broadcast %c1_i32_93 : i32 to vector<16x16xi32>
      %242 = arith.addi %17, %241 : vector<16x16xi32>
      %c16_i32_94 = arith.constant 16 : i32
      %243 = vector.broadcast %c16_i32_94 : i32 to vector<16x16xi32>
      %244 = arith.cmpi slt, %242, %243 : vector<16x16xi32>
      %245 = arith.andi %240, %244 : vector<16x16xi1>
      %cst_95 = arith.constant 0.000000e+00 : f32
      %246 = vector.broadcast %cst_95 : f32 to vector<16x16xf32>
      %247 = arith.select %245, %236, %246 : vector<16x16xi1>, vector<16x16xf32>
      %c1_i32_96 = arith.constant 1 : i32
      %248 = tpu.dynamic_rotate %247 by %c1_i32_96 dim 1 : vector<16x16xf32>, i32 -> vector<16x16xf32>
      %c-1_i32_97 = arith.constant -1 : i32
      %249 = vector.broadcast %c-1_i32_97 : i32 to vector<16x16xi32>
      %250 = arith.addi %18, %249 : vector<16x16xi32>
      %c0_i32_98 = arith.constant 0 : i32
      %251 = vector.broadcast %c0_i32_98 : i32 to vector<16x16xi32>
      %252 = arith.cmpi sge, %250, %251 : vector<16x16xi32>
      %c-1_i32_99 = arith.constant -1 : i32
      %253 = vector.broadcast %c-1_i32_99 : i32 to vector<16x16xi32>
      %254 = arith.addi %18, %253 : vector<16x16xi32>
      %c16_i32_100 = arith.constant 16 : i32
      %255 = vector.broadcast %c16_i32_100 : i32 to vector<16x16xi32>
      %256 = arith.cmpi slt, %254, %255 : vector<16x16xi32>
      %257 = arith.andi %252, %256 : vector<16x16xi1>
      %cst_101 = arith.constant 0.000000e+00 : f32
      %258 = vector.broadcast %cst_101 : f32 to vector<16x16xf32>
      %259 = arith.select %257, %248, %258 : vector<16x16xi1>, vector<16x16xf32>
      %c15 = arith.constant 15 : index
      %260 = memref.load %arg2[%c15] : memref<18xf32, #tpu.memory_space<smem>>
      %261 = vector.broadcast %260 : f32 to vector<16x16xf32>
      %262 = arith.mulf %261, %259 : vector<16x16xf32>
      %263 = arith.addf %235, %262 : vector<16x16xf32>
      %c16 = arith.constant 16 : index
      %264 = memref.load %arg2[%c16] : memref<18xf32, #tpu.memory_space<smem>>
      %265 = vector.broadcast %264 : f32 to vector<16x16xf32>
      %266 = arith.mulf %265, %247 : vector<16x16xf32>
      %267 = arith.addf %263, %266 : vector<16x16xf32>
      %c15_i32_102 = arith.constant 15 : i32
      %268 = tpu.dynamic_rotate %247 by %c15_i32_102 dim 1 : vector<16x16xf32>, i32 -> vector<16x16xf32>
      %c1_i32_103 = arith.constant 1 : i32
      %269 = vector.broadcast %c1_i32_103 : i32 to vector<16x16xi32>
      %270 = arith.addi %18, %269 : vector<16x16xi32>
      %c0_i32_104 = arith.constant 0 : i32
      %271 = vector.broadcast %c0_i32_104 : i32 to vector<16x16xi32>
      %272 = arith.cmpi sge, %270, %271 : vector<16x16xi32>
      %c1_i32_105 = arith.constant 1 : i32
      %273 = vector.broadcast %c1_i32_105 : i32 to vector<16x16xi32>
      %274 = arith.addi %18, %273 : vector<16x16xi32>
      %c16_i32_106 = arith.constant 16 : i32
      %275 = vector.broadcast %c16_i32_106 : i32 to vector<16x16xi32>
      %276 = arith.cmpi slt, %274, %275 : vector<16x16xi32>
      %277 = arith.andi %272, %276 : vector<16x16xi1>
      %cst_107 = arith.constant 0.000000e+00 : f32
      %278 = vector.broadcast %cst_107 : f32 to vector<16x16xf32>
      %279 = arith.select %277, %268, %278 : vector<16x16xi1>, vector<16x16xf32>
      %c17 = arith.constant 17 : index
      %280 = memref.load %arg2[%c17] : memref<18xf32, #tpu.memory_space<smem>>
      %281 = vector.broadcast %280 : f32 to vector<16x16xf32>
      %282 = arith.mulf %281, %279 : vector<16x16xf32>
      %283 = arith.addf %267, %282 : vector<16x16xf32>
      %284 = arith.negf %283 : vector<16x16xf32>
      %285 = math.exp %284 : vector<16x16xf32>
      %cst_108 = arith.constant 1.000000e+00 : f32
      %286 = vector.broadcast %cst_108 : f32 to vector<16x16xf32>
      %287 = arith.addf %286, %285 : vector<16x16xf32>
      %288 = arith.divf %286, %287 : vector<16x16xf32>
      %c0_109 = arith.constant 0 : index
      %c0_110 = arith.constant 0 : index
      %c0_111 = arith.constant 0 : index
      %289 = vector.load %arg4[%c0_109, %c0_110, %c0_111] : memref<1x16x16xf32, #tpu.memory_space<vmem>>, vector<1x16x16xf32>
      %290 = vector.shape_cast %289 : vector<1x16x16xf32> to vector<16x16xf32>
      %291 = vector.shape_cast %288 : vector<16x16xf32> to vector<1x16x16xf32>
      tpu.vector_store %arg4[%c0_109, %c0_110, %c0_111], %291 {strides = array<i32>} : memref<1x16x16xf32, #tpu.memory_space<vmem>>, vector<1x16x16xf32>,
    } else {
    }
    return
  }
  func.func @transform_0(%arg0: i32, %arg1: i32) -> i32 {
    %c0_i32 = arith.constant 0 : i32
    %c0_i32_0 = arith.constant 0 : i32
    return %c0_i32 : i32
  }
  func.func @transform_1(%arg0: i32, %arg1: i32) -> (i32, i32, i32, i32) {
    %c0_i32 = arith.constant 0 : i32
    %c0_i32_0 = arith.constant 0 : i32
    %c0_i32_1 = arith.constant 0 : i32
    return %arg0, %arg1, %c0_i32, %c0_i32_0 : i32, i32, i32, i32
  }
  func.func @transform_2(%arg0: i32, %arg1: i32) -> (i32, i32, i32) {
    %c0_i32 = arith.constant 0 : i32
    %c0_i32_0 = arith.constant 0 : i32
    %c0_i32_1 = arith.constant 0 : i32
    return %arg0, %c0_i32, %c0_i32_0 : i32, i32, i32
  }
}

</mosaic_0001>

<bundles_post_ra>
// kernel: tpu_custom_call.1
= control target key start
LH: loop header
LB: loop body
LE: loop exit
PB: predicated region body
PF: predicated region fallthrough
CT: control target
= control target key end

     0   :  { %7 = vsyncpa [#allocation7], 0  ;;  %s1506_s0 = inlined_call_operand.hbm [shape: f32[18], index: 0, kind: input, shape index: {}]   ;;  %s1507_s1 = inlined_call_operand.hbm [shape: f32[2,4,16,16], index: 1, kind: input, shape index: {}]   ;;  %s1508_s2 = inlined_call_operand.hbm [shape: f32[2,16,16], index: 2, kind: output, shape index: {}]  }
   0x1   :  { %8 = vsyncpa [#allocation5], 0 }
   0x2   :  { %10 = vsyncpa [#allocation5 + $0x1], 0 }
   0x3   :  { %11 = vsyncpa [#allocation6], 0 }
   0x4   :  { %13 = vsyncpa [#allocation6 + $0x1], 0  ;;  %s1044_s9 = smov 0   ;;  %s1046_s10 = smov 0  }
   0x5   :  { %s1048_s11 = smov 0   ;;  %s1050_s12 = smov 0  }
   0x6   :  { %s1052_s13 = smov 0   ;;  %s1054_s14 = smov 0  }
   0x7 LB: > { %s762_s15 = sadd.s32 4294967295, %s1019_s14   ;;  %s763_s16 = sadd.s32 4294967294, %s1019_s14   ;;  %s1019_s14 = sphi %s1054_s14, %s19_s14   ;;  %s1015_s13 = sphi %s1052_s13, %s1522_s13   ;;  %s1011_s12 = sphi %s1050_s12, %s1521_s12   ;;  %s1007_s11 = sphi %s1048_s11, %s1520_s11   ;;  %s1003_s10 = sphi %s1046_s10, %s1519_s10   ;;  %s999_s9 = sphi %s1044_s9, %s1518_s9  }
   0x8   : > { %s61_s17 = sadd.s32 1, %s1007_s11  ;;  %p68_p0 = scmp.ne.s32.totalorder %s1007_s11, %s1003_s10 }
   0x9   : > { %p69_p1 = scmp.eq.s32.totalorder %s1019_s14, 0  ;;  %p74_p2 = scmp.ne.s32.totalorder %s1003_s10, %s999_s9 }
   0xa   : > { %p1082_p3 = scmp.eq.s32.totalorder %s762_s15, 0  ;;  %p98_p4 = scmp.eq.s32.totalorder %s762_s15, 1 }
   0xb   : > { %p1086_p5 = por %p69_p1, %p68_p0  ;;  %p104_p6 = scmp.eq.s32.totalorder %s763_s16, 1 }
   0xc   : > { %p1092_p7 = por %p1082_p3, %p74_p2  ;;  %p1096_p8 = por %p98_p4, %p68_p0 }
   0xd   : > { %p1100_p9 = por %p104_p6, %p74_p2  ;;  %p764_p10 = scmp.ge.s32.totalorder %s1019_s14, 1 }
   0xe   : > { %p111_p11 = scmp.lt.s32.totalorder %s1019_s14, 3  ;;  %s123_s25 = sshll.u32 %s1506_s0, 4  ;;  %s124_s25 = int_to_ptr.hbm [resolvable:$true] %s123_s25 }
   0xf   : > { %p766_p13 = scmp.ge.s32.totalorder %s1019_s14, 2  ;;  %p821_p0 = scmp.lt.s32.totalorder %s1019_s14, 2 }
  0x10   : > { %p1109_p12 = pnand %p764_p10, %p111_p11  ;;  %s31_s28 = sadd.s32 1, %s1015_s13 }
  0x11   : > { %p1119_p2 = pnand %p821_p0, %p1086_p5  ;;  %p33_p6 = scmp.ge.s32.totalorder %s31_s28, 2 }
  0x12   : > { %p808_p1 = pneg %p1109_p12  ;;  %s134_s29 = sand.u32 1, %s1007_s11  }
  0x13   : > { %s1021_s30 = smov [#allocation4]   ;;  %s1524_s28 = smov (%p33_p6, %s31_s28), 0 }
  0x14   : > { %p809_p4 = pnand %p808_p1, %p1082_p3  ;;  %s767_s3 = sshll.u32 %s134_s29, 6 }
  0x15   : > { %s56_s4 = ssub.s32 %s1015_s13, %s1524_s28  ;;  %s798_s5 = sshll.u32 %s1015_s13, 6 }
  0x16   : > { %811 = dma.hbm_to_smem (!%p809_p4), %s124_s25, 16, %s1021_s30, [#allocation7]  }
  0x17   : > { %p59_p10 = scmp.eq.s32.totalorder %s56_s4, 0  ;;  %s146_s8 = scalar_lea.hbm %s1507_s1, %s798_s5 }
  0x18   : > { %s138_s15 = scalar_lea.vmem [#allocation8], %s767_s3  ;;  %s147_s23 = sshll.u32 %s146_s8, 4  ;;  %s148_s23 = int_to_ptr.hbm [resolvable:$true] %s147_s23 }
  0x19   : > { %s149_s16 = sshll.u32 %s138_s15, 4  ;;  %s135_s24 = scalar_lea.sflag [#allocation5], %s134_s29  ;;  %s150_s16 = int_to_ptr.vmem [resolvable:$true] %s149_s16 }
  0x1a   : > { %s1138_s19 = scalar_select %p59_p10, %s1007_s11, %s61_s17  }
  0x1b   : > { %s1022_s25 = smov 128   ;;  %s1023_s30 = smov 8  }
  0x1c   : > { %815 = dma.hbm_to_vmem [thread:$0]  (!%p1119_p2), %s148_s23, 1024, %s150_s16, %s135_s24, %s1022_s25, %s1022_s25, %s1023_s30  }
  0x1d   : > { %161 = sbr.rel (%p1109_p12) target bundleno = 516 (0x204), region = 28 }
  0x22   : > { %986 = dma.done.wait (%p1082_p3), [#allocation7], 16  }
  0x23   : > { %988 = vsyncadd (%p1082_p3), [#allocation7], 4294967280  ;;  %s1149_s17 = sand.u32 1, %s1003_s10  }
  0x24   : > { %s772_s29 = sshll.u32 %s1149_s17, 6  ;;  %s169_s3 = scalar_lea.sflag [#allocation5], %s1149_s17 }
  0x25   : > { %s172_s4 = scalar_lea.vmem [#allocation8], %s772_s29 }
  0x26   : > { %990 = dma.done.wait (%p1092_p7), %s169_s3, 1024  }
  0x27   : > { %992 = vsyncadd (%p1092_p7), %s169_s3, 4294966272 }
  0x28   : > { %178 = sfence }
  0x29   : > { %v196_v0 = vld [vmem:[%s172_s4] sm:$0xff]  ;;  %v198_v1 = vld [vmem:[%s172_s4 + $0x10] sm:$0xff]  ;;  %vm204_vm0 = vcmask 130048   ;;  %v197_v7 = vld [vmem:[%s172_s4 + $0x8] sm:$0xff]  ;;  %v266_v32 = vlaneseq  ;;  %s1024_s18 = smov 16   ;;  %vm286_vm5 = vcmask 1047680  }
  0x2a   : > { %v200_v2 = vld [vmem:[%s172_s4 + $0x20] sm:$0xff]  ;;  %v202_v3 = vld [vmem:[%s172_s4 + $0x30] sm:$0xff]  ;;  %v205_v4 = vsel %vm204_vm0, %v196_v0, 0.0  ;;  %v206_v5 = vsel %vm204_vm0, %v198_v1, 0.0  ;;  %v199_v8 = vld [vmem:[%s172_s4 + $0x18] sm:$0xff]  ;;  %v212_v12 = vsel %vm204_vm0, %v197_v7, 0.0 }
  0x2b   : > { %v208_v6 = vsel %vm204_vm0, %v200_v2, 0.0  ;;  %v207_v9 = vadd.f32 %v206_v5, %v205_v4  ;;  %v201_v10 = vld [vmem:[%s172_s4 + $0x28] sm:$0xff]  ;;  %v203_v11 = vld [vmem:[%s172_s4 + $0x38] sm:$0xff]  ;;  %v213_v13 = vsel %vm204_vm0, %v199_v8, 0.0  ;;  %v210_v14 = vsel %vm204_vm0, %v202_v3, 0.0  ;;  %s1025_s20 = smov 127  }
  0x2c   : > { %v214_v15 = vadd.f32 %v213_v13, %v212_v12  ;;  %v215_v16 = vsel %vm204_vm0, %v201_v10, 0.0  ;;  %v217_v18 = vsel %vm204_vm0, %v203_v11, 0.0  ;;  %v219_v19 = vsel %vm204_vm0, %v196_v0, -inf  ;;  %s1026_s26 = smov 113   ;;  %s1338_s27 = sld [smem:[#allocation4 + $0x1]] }
  0x2d   : > { %v209_v17 = vadd.f32 %v208_v6, %v207_v9  ;;  %v220_v21 = vsel %vm204_vm0, %v198_v1, -inf  ;;  %v221_v23 = vsel %vm204_vm0, %v200_v2, -inf  ;;  %v223_v26 = vsel %vm204_vm0, %v202_v3, -inf  ;;  %s1341_s5 = sld [smem:[#allocation4]] }
  0x2e   : > { %v216_v20 = vadd.f32 %v215_v16, %v214_v15  ;;  %v222_v25 = vmax.f32 %v219_v19, %v221_v23  ;;  %v224_v27 = vmax.f32 %v220_v21, %v223_v26  ;;  %v226_v28 = vsel %vm204_vm0, %v197_v7, -inf  ;;  %s1343_s6 = sld [smem:[#allocation4 + $0x2]] }
  0x2f   : > { %v211_v22 = vadd.f32 %v210_v14, %v209_v17  ;;  %v227_v29 = vsel %vm204_vm0, %v199_v8, -inf  ;;  %v228_v30 = vsel %vm204_vm0, %v201_v10, -inf  ;;  %v230_v31 = vsel %vm204_vm0, %v203_v11, -inf  ;;  %s1345_s7 = sld [smem:[#allocation4 + $0x4]] }
  0x30   : > { %v218_v24 = vadd.f32 %v217_v18, %v216_v20  ;;  %v225_v33 = vmax.f32 %v222_v25, %v224_v27  ;;  %v229_v34 = vmax.f32 %v226_v28, %v228_v30  ;;  %v231_v35 = vmax.f32 %v227_v29, %v230_v31  ;;  %s1349_s8 = sld [smem:[#allocation4 + $0x5]] }
  0x31   : > { %237 = vst.msk [vmem:[#allocation2] sm:$0xff] %vm204_vm0, %v211_v22  ;;  %v267_v37 = vshrl.u32 %v266_v32, 7  ;;  %s1351_s15 = sld [smem:[#allocation4 + $0x3]] }
  0x32   : > { %238 = vst.msk [vmem:[#allocation2 + $0x8] sm:$0xff] %vm204_vm0, %v218_v24  ;;  %v232_v36 = vmax.f32 %v229_v34, %v231_v35  ;;  %s1360_s16 = sld [smem:[#allocation4 + $0x6]] }
  0x33   : > { %239 = vst.msk [vmem:[#allocation3] sm:$0xff] %vm204_vm0, %v225_v33  ;;  %vm273_vm1 = vcmp.lt.s32.totalorder %v267_v37, 1  ;;  %vm393_vm2 = vcmp.lt.s32.totalorder %v267_v37, 7  ;;  %v276_v46 = vadd.s32 4294967295, %v267_v37  ;;  %v268_v52 = vadd.s32 8, %v267_v37  ;;  %s1368_s23 = sld [smem:[#allocation4 + $0x7]] }
  0x34   : > { %240 = vst.msk [vmem:[#allocation3 + $0x8] sm:$0xff] %vm204_vm0, %v232_v36  ;;  %s1370_s24 = sld [smem:[#allocation4 + $0xa]] }
  0x35   : > { %vm278_vm3 = vcmp.ge.s32.totalorder %v276_v46, 0  ;;  %v397_v56 = vadd.s32 1, %v268_v52  ;;  %s1380_s25 = sld [smem:[#allocation4 + $0x8]] }
  0x36   : > { %s1390_s30 = sld [smem:[#allocation4 + $0xb]] }
  0x37   : > { %vm401_vm4 = vcmp.lt.s32.totalorder %v397_v56, 16  ;;  %s1396_s29 = sld [smem:[#allocation4 + $0x9]] }
  0x38   : > { %v260_v38 = vld [vmem:[#allocation2] sm:$0xff]  ;;  %s1403_s3 = sld [smem:[#allocation4 + $0xc]] }
  0x39   : > { %v1178_v39 = vmul.f32 0.25, %v260_v38  ;;  %v261_v40 = vld [vmem:[#allocation2 + $0x8] sm:$0xff]  ;;  %s1411_s4 = sld [smem:[#allocation4 + $0xd]] }
  0x3a   : > { %v1180_v41 = vmul.f32 0.25, %v261_v40  ;;  %v1199_v50 = vld [vmem:[#allocation3] sm:$0xff] }
  0x3b   : > { %343 = vrot.lane.b32.xlu1 %v1178_v39, %s1024_s18  ;;  %v271_v42 = vrot.slane %v1178_v39, 7  ;;  %v391_v43 = vrot.slane %v1178_v39, 1  ;;  %v1201_v51 = vld [vmem:[#allocation3 + $0x8] sm:$0xff]  ;;  %v454_v54 = vrot.slane %v1199_v50, 7  ;;  %v556_v62 = vrot.slane %v1199_v50, 1 }
  0x3c   : > { %v272_v44 = vrot.slane %v1180_v41, 7  ;;  %v392_v45 = vrot.slane %v1180_v41, 1  ;;  %v455_v55 = vrot.slane %v1201_v51, 7  ;;  %v557_v63 = vrot.slane %v1201_v51, 1 }
  0x3e   : > { %v1189_v47 = vsel %vm273_vm1, %v271_v42, %v272_v44  ;;  %v1192_v48 = vsel %vm393_vm2, %v391_v43, %v392_v45  ;;  %v275_v49 = vsel %vm273_vm1, %v272_v44, %v271_v42  ;;  %v1215_v57 = vsel %vm273_vm1, %v454_v54, %v455_v55 }
  0x3f   : > { %290 = vrot.lane.b32.xlu0 %v1189_v47, %s1024_s18  ;;  %406 = vrot.lane.b32.xlu2 %v1192_v48, %s1024_s18  ;;  %v1206_v53 = vsel %vm278_vm3, %v275_v49, 0.0  ;;  %v457_v58 = vsel %vm273_vm1, %v455_v55, %v454_v54  ;;  %v395_v59 = vsel %vm393_vm2, %v392_v45, %v391_v43  ;;  %v1233_v0 = vsel %vm393_vm2, %v556_v62, %v557_v63 }
  0x40   : > { %v1222_v60 = vsel %vm278_vm3, %v457_v58, 0.0  ;;  %v1224_v61 = vsel %vm401_vm4, %v395_v59, 0.0  ;;  %v559_v1 = vsel %vm393_vm2, %v557_v63, %v556_v62 }
  0x41   : > { %v1238_v2 = vsel %vm401_vm4, %v559_v1, 0.0 }
  0x43   : > { %346 = vrot.lane.b32.xlu1 %v1180_v41, %s1024_s18 }
  0x47   : > { %287 = vrot.lane.b32.xlu0 %v1206_v53, %s1024_s18  ;;  %508 = vrot.lane.b32.xlu2 %v1199_v50, %s1024_s18 }
  0x4b   : > { %463 = vrot.lane.b32.xlu1 %v1215_v57, %s1024_s18 }
  0x4f   : > { %460 = vrot.lane.b32.xlu0 %v1222_v60, %s1024_s18  ;;  %409 = vrot.lane.b32.xlu2 %v1224_v61, %s1024_s18 }
  0x53   : > { %562 = vrot.lane.b32.xlu1 %v1233_v0, %s1024_s18 }
  0x57   : > { %511 = vrot.lane.b32.xlu0 %v1201_v51, %s1024_s18  ;;  %565 = vrot.lane.b32.xlu2 %v1238_v2, %s1024_s18 }
  0x99   : > { %v407_v3 = vpop.permute.xlu2 %406 }
  0x9a   : > { %v408_v23 = vsel %vm286_vm5, %v407_v3, %v1192_v48 }
  0xa1   : > { %v509_v4 = vpop.permute.xlu2 %508 }
  0xa2   : > { %v510_v5 = vsel %vm286_vm5, %v509_v4, %v1199_v50 }
  0xa3   : > { %514 = vrot.lane.b32.xlu2 %v510_v5, %s1024_s18 }
  0xa9   : > { %v410_v8 = vpop.permute.xlu2 %409 }
  0xaa   : > { %v411_v17 = vsel %vm286_vm5, %v410_v8, %v1224_v61 }
  0xad   : > { %v344_v6 = vpop.permute.xlu1 %343 }
  0xae   : > { %v345_v7 = vsel %vm286_vm5, %v344_v6, %v1178_v39 }
  0xaf   : > { %349 = vrot.lane.b32.xlu2 %v345_v7, %s1024_s18  ;;  %v270_v7 = vand.u32 127, %v266_v32  ;;  %v320_v32 = vstv %s1338_s27  ;;  %s1447_s27 = sld [smem:[#allocation4 + $0x11]] }
  0xb1   : > { %v291_v9 = vpop.permute.xlu0 %290  ;;  %v566_v12 = vpop.permute.xlu2 %565 }
  0xb2   : > { %v567_v13 = vsel %vm286_vm5, %v566_v12, %v1238_v2  ;;  %v292_v20 = vsel %vm286_vm5, %v291_v9, %v1189_v47 }
  0xb5   : > { %v347_v10 = vpop.permute.xlu1 %346 }
  0xb6   : > { %v348_v11 = vsel %vm286_vm5, %v347_v10, %v1180_v41  ;;  %v299_v10 = vadd.s32 4294967295, %v270_v7 }
  0xb7   : > { %351 = vrot.lane.b32.xlu0 %v348_v11, %s1024_s18  ;;  %570 = vrot.lane.b32.xlu2 %v567_v13, %s1024_s18  ;;  %v1347_v11 = vadd.s32 1, %v270_v7  ;;  %v314_v13 = vstv %s1341_s5  ;;  %v449_v7 = vstv %s1380_s25  ;;  %s773_s5 = sshll.u32 %s1149_s17, 4 }
  0xb8   : > { %vm300_vm6 = vcmp.ge.s32.totalorder %v299_v10, 0  ;;  %vm301_vm7 = vcmp.lt.s32.totalorder %v299_v10, 16 }
  0xb9   : > { %v288_v14 = vpop.permute.xlu0 %287  ;;  %vm1355_vm8 = vmand %vm300_vm6, %vm301_vm7  ;;  %vm327_vm9 = vcmp.lt.s32.totalorder %v1347_v11, 16 }
  0xba   : > { %v289_v21 = vsel %vm286_vm5, %v288_v14, %v1206_v53 }
  0xbd   : > { %v464_v15 = vpop.permute.xlu1 %463 }
  0xbe   : > { %v465_v16 = vsel %vm286_vm5, %v464_v15, %v1215_v57  ;;  %v321_v15 = vmul.f32 %v320_v32, %v1206_v53 }
  0xbf   : > { %468 = vrot.lane.b32.xlu1 %v465_v16, %s1024_s18  ;;  %414 = vrot.lane.b32.xlu2 %v411_v17, %s1024_s18  ;;  %v338_v17 = vstv %s1343_s6  ;;  %s799_s6 = sshll.u32 %s1011_s12, 4 }
  0xc1   : > { %v461_v18 = vpop.permute.xlu0 %460 }
  0xc2   : > { %v462_v19 = vsel %vm286_vm5, %v461_v18, %v1222_v60 }
  0xc3   : > { %466 = vrot.lane.b32.xlu0 %v462_v19, %s1024_s18 }
  0xc5   : > { %v563_v25 = vpop.permute.xlu1 %562 }
  0xc6   : > { %v564_v26 = vsel %vm286_vm5, %v563_v25, %v1233_v0 }
  0xc7   : > { %295 = vrot.lane.b32.xlu1 %v292_v20, %s1024_s18 }
  0xc9   : > { %v512_v22 = vpop.permute.xlu0 %511 }
  0xca   : > { %v513_v24 = vsel %vm286_vm5, %v512_v22, %v1201_v51 }
  0xcb   : > { %293 = vrot.lane.b32.xlu0 %v289_v21, %s1024_s18 }
  0xcf   : > { %412 = vrot.lane.b32.xlu1 %v408_v23, %s1024_s18  ;;  %v372_v23 = vstv %s1345_s7 }
  0xd3   : > { %516 = vrot.lane.b32.xlu0 %v513_v24, %s1024_s18 }
  0xd7   : > { %568 = vrot.lane.b32.xlu1 %v564_v26, %s1024_s18  ;;  %s1425_s18 = sld [smem:[#allocation4 + $0xe]] }
  0xfd   : > { %v515_v27 = vpop.permute.xlu2 %514 }
  0xfe   : > { %v518_v55 = vsel %vm286_vm5, %v515_v27, %v1199_v50  ;;  %v322_v27 = vmul.f32 %v320_v32, %v1189_v47 }
 0x109   : > { %v350_v28 = vpop.permute.xlu2 %349 }
 0x10a   : > { %v353_v29 = vsel %vm286_vm5, %v350_v28, %v1178_v39 }
 0x10b   : > { %377 = vrot.lane.b32.xlu0 %v353_v29, %s1025_s20 }
 0x111   : > { %v571_v40 = vpop.permute.xlu2 %570 }
 0x112   : > { %v573_v59 = vsel %vm286_vm5, %v571_v40, %v1238_v2 }
 0x119   : > { %v415_v46 = vpop.permute.xlu2 %414 }
 0x11a   : > { %v417_v49 = vsel %vm286_vm5, %v415_v46, %v1224_v61 }
 0x129   : > { %v352_v30 = vpop.permute.xlu0 %351 }
 0x12a   : > { %v354_v31 = vsel %vm286_vm5, %v352_v30, %v1180_v41 }
 0x12b   : > { %359 = vrot.lane.b32.xlu2 %v354_v31, %s1026_s26 }
 0x131   : > { %v469_v33 = vpop.permute.xlu1 %468 }
 0x132   : > { %v471_v34 = vsel %vm286_vm5, %v469_v33, %v1215_v57 }
 0x133   : > { %476 = vrot.lane.b32.xlu1 %v471_v34, %s1026_s26 }
 0x135   : > { %v467_v35 = vpop.permute.xlu0 %466 }
 0x136   : > { %v470_v36 = vsel %vm286_vm5, %v467_v35, %v1222_v60 }
 0x137   : > { %474 = vrot.lane.b32.xlu0 %v470_v36, %s1026_s26  ;;  %494 = vrot.lane.b32.xlu2 %v470_v36, %s1025_s20 }
 0x139   : > { %v296_v37 = vpop.permute.xlu1 %295 }
 0x13a   : > { %v298_v38 = vsel %vm286_vm5, %v296_v37, %v1189_v47 }
 0x13b   : > { %357 = vrot.lane.b32.xlu1 %v353_v29, %s1026_s26  ;;  %v366_v29 = vstv %s1351_s15  ;;  %s662_s15 = scalar_lea.hbm %s1508_s2, %s799_s6 }
 0x13c   : > { %s665_s12 = sshll.u32 %s662_s15, 4  ;;  %s666_s12 = int_to_ptr.hbm [resolvable:$true] %s665_s12 }
 0x13d   : > { %v294_v44 = vpop.permute.xlu0 %293  ;;  %s947_s25 = sshra.s32 %s666_s12, 4  ;;  %s948_s25 = int_to_ptr.hbm [resolvable:$true] %s947_s25 }
 0x13e   : > { %v297_v45 = vsel %vm286_vm5, %v294_v44, %v1206_v53  ;;  %v386_v53 = vstv %s1349_s8  ;;  %v429_v44 = vstv %s1360_s16  ;;  %s194_s16 = scalar_lea.vmem [#allocation9], %s773_s5  ;;  %p954_p11 = scmp.lt.s32.totalorder %s948_s25, %s1508_s2 }
 0x13f   : > { %331 = vrot.lane.b32.xlu0 %v298_v38, %s1025_s20 }
 0x141   : > { %v413_v42 = vpop.permute.xlu1 %412 }
 0x142   : > { %v416_v43 = vsel %vm286_vm5, %v413_v42, %v1192_v48 }
 0x143   : > { %379 = vrot.lane.b32.xlu1 %v354_v31, %s1025_s20  ;;  %420 = vrot.lane.b32.xlu2 %v416_v43, %s1026_s26 }
 0x145   : > { %v517_v52 = vpop.permute.xlu0 %516 }
 0x146   : > { %v519_v54 = vsel %vm286_vm5, %v517_v52, %v1201_v51 }
 0x147   : > { %305 = vrot.lane.b32.xlu0 %v297_v45, %s1026_s26 }
 0x149   : > { %v569_v56 = vpop.permute.xlu1 %568 }
 0x14a   : > { %v572_v58 = vsel %vm286_vm5, %v569_v56, %v1233_v0 }
 0x14b   : > { %307 = vrot.lane.b32.xlu1 %v298_v38, %s1026_s26  ;;  %329 = vrot.lane.b32.xlu2 %v297_v45, %s1025_s20 }
 0x14f   : > { %422 = vrot.lane.b32.xlu0 %v417_v49, %s1026_s26 }
 0x153   : > { %440 = vrot.lane.b32.xlu1 %v416_v43, %s1025_s20  ;;  %442 = vrot.lane.b32.xlu2 %v417_v49, %s1025_s20 }
 0x157   : > { %496 = vrot.lane.b32.xlu0 %v471_v34, %s1025_s20  ;;  %v373_v34 = vmul.f32 %v372_v23, %v1178_v39  ;;  %v435_v39 = vstv %s1368_s23  ;;  %s663_s23 = sshll.u32 %s194_s16, 4  ;;  %s664_s23 = int_to_ptr.vmem [resolvable:$true] %s663_s23 }
 0x15b   : > { %522 = vrot.lane.b32.xlu1 %v518_v55, %s1026_s26  ;;  %524 = vrot.lane.b32.xlu2 %v519_v54, %s1026_s26 }
 0x15f   : > { %542 = vrot.lane.b32.xlu0 %v518_v55, %s1025_s20  ;;  %v489_v55 = vstv %s1370_s24  ;;  %s651_s24 = scalar_lea.sflag [#allocation6], %s1149_s17 }
 0x163   : > { %544 = vrot.lane.b32.xlu1 %v519_v54, %s1025_s20  ;;  %576 = vrot.lane.b32.xlu2 %v572_v58, %s1026_s26  ;;  %v374_v54 = vmul.f32 %v372_v23, %v1180_v41  ;;  %v483_v23 = vstv %s1396_s29 }
 0x167   : > { %578 = vrot.lane.b32.xlu0 %v573_v59, %s1026_s26  ;;  %s1437_s26 = sld [smem:[#allocation4 + $0x10]] }
 0x16b   : > { %596 = vrot.lane.b32.xlu1 %v572_v58, %s1025_s20  ;;  %598 = vrot.lane.b32.xlu2 %v573_v59, %s1025_s20  ;;  %s1431_s20 = sld [smem:[#allocation4 + $0xf]] }
 0x17d   : > { %v378_v1 = vpop.permute.xlu0 %377 }
 0x17e   : > { %v383_v28 = vsel %vm327_vm9, %v378_v1, 0.0  ;;  %v436_v1 = vmul.f32 %v435_v39, %v1192_v48 }
 0x17f   : > { %v387_v43 = vmul.f32 %v386_v53, %v383_v28 }
 0x185   : > { %v1328_v62 = vpop.permute.xlu2 %359 }
 0x186   : > { %v364_v47 = vsel %vm1355_vm8, %v1328_v62, 0.0 }
 0x187   : > { %v368_v46 = vmul.f32 %v366_v29, %v364_v47 }
 0x191   : > { %v1330_v63 = vpop.permute.xlu2 %494 }
 0x19d   : > { %v1334_v4 = vpop.permute.xlu2 %420 }
 0x19e   : > { %v426_v45 = vsel %vm1355_vm8, %v1334_v4, 0.0 }
 0x19f   : > { %v430_v58 = vmul.f32 %v429_v44, %v426_v45 }
 0x1a5   : > { %v1332_v3 = vpop.permute.xlu1 %476  ;;  %v330_v8 = vpop.permute.xlu2 %329 }
 0x1a6   : > { %v335_v18 = vsel %vm327_vm9, %v330_v8, 0.0 }
 0x1a7   : > { %v339_v24 = vmul.f32 %v338_v17, %v335_v18 }
 0x1a9   : > { %v1336_v5 = vpop.permute.xlu0 %474 }
 0x1aa   : > { %v480_v48 = vsel %vm1355_vm8, %v1336_v5, 0.0 }
 0x1ab   : > { %v484_v5 = vmul.f32 %v483_v23, %v480_v48 }
 0x1ad   : > { %v358_v6 = vpop.permute.xlu1 %357  ;;  %v443_v20 = vpop.permute.xlu2 %442 }
 0x1ae   : > { %v363_v22 = vsel %vm1355_vm8, %v358_v6, 0.0 }
 0x1af   : > { %v367_v33 = vmul.f32 %v366_v29, %v363_v22  ;;  %v500_v22 = vsel %vm327_vm9, %v1330_v63, 0.0 }
 0x1b1   : > { %v332_v9 = vpop.permute.xlu0 %331 }
 0x1b2   : > { %v336_v30 = vsel %vm327_vm9, %v332_v9, 0.0 }
 0x1b3   : > { %v340_v37 = vmul.f32 %v338_v17, %v336_v30  ;;  %v531_v30 = vstv %s1403_s3 }
 0x1b5   : > { %v380_v12 = vpop.permute.xlu1 %379  ;;  %v525_v59 = vpop.permute.xlu2 %524 }
 0x1b6   : > { %v384_v56 = vsel %vm327_vm9, %v380_v12, 0.0 }
 0x1b7   : > { %v388_v9 = vmul.f32 %v386_v53, %v384_v56 }
 0x1b9   : > { %v306_v16 = vpop.permute.xlu0 %305 }
 0x1ba   : > { %v311_v19 = vsel %vm1355_vm8, %v306_v16, 0.0 }
 0x1bb   : > { %v315_v21 = vmul.f32 %v314_v13, %v311_v19 }
 0x1bd   : > { %v323_v25 = vadd.f32 %v321_v15, %v315_v21  ;;  %v308_v26 = vpop.permute.xlu1 %307  ;;  %v437_v15 = vmul.f32 %v435_v39, %v1224_v61  ;;  %v503_v21 = vstv %s1390_s30  ;;  %v481_v61 = vsel %vm1355_vm8, %v1332_v3, 0.0  ;;  %s949_s30 = scalar_lea.hbm %s948_s25, 16 }
 0x1be   : > { %v312_v31 = vsel %vm1355_vm8, %v308_v26, 0.0  ;;  %v485_v63 = vmul.f32 %v483_v23, %v481_v61  ;;  %v491_v3 = vmul.f32 %v489_v55, %v1215_v57  ;;  %p950_p3 = scmp.ne.s32.totalorder %s948_s25, %s949_s30 }
 0x1bf   : > { %v341_v35 = vadd.f32 %v339_v24, %v323_v25  ;;  %v316_v36 = vmul.f32 %v314_v13, %v312_v31  ;;  %v490_v13 = vmul.f32 %v489_v55, %v1222_v60  ;;  %v447_v60 = vsel %vm327_vm9, %v443_v20, 0.0 }
 0x1c0   : > { %v504_v25 = vmul.f32 %v503_v21, %v500_v22  ;;  %v451_v26 = vmul.f32 %v449_v7, %v447_v60  ;;  %v537_v31 = vstv %s1411_s4  ;;  %p951_p5 = pnand %p950_p3, %p1096_p8  ;;  %s953_s4 = scalar_lea.hbm %s1508_s2, 32 }
 0x1c1   : > { %v369_v38 = vadd.f32 %v367_v33, %v341_v35  ;;  %v324_v40 = vadd.f32 %v322_v27, %v316_v36  ;;  %v423_v42 = vpop.permute.xlu0 %422  ;;  %v577_v33 = vpop.permute.xlu2 %576  ;;  %v539_v56 = vmul.f32 %v537_v31, %v1201_v51  ;;  %p955_p12 = scmp.lt.s32.totalorder %s953_s4, %s949_s30 }
 0x1c2   : > { %v427_v8 = vsel %vm1355_vm8, %v423_v42, 0.0  ;;  %v538_v42 = vmul.f32 %v537_v31, %v1199_v50  ;;  %v582_v50 = vsel %vm1355_vm8, %v577_v33, 0.0  ;;  %p952_p7 = pneg %p951_p5 }
 0x1c3   : > { %v375_v49 = vadd.f32 %v373_v34, %v369_v38  ;;  %v342_v52 = vadd.f32 %v340_v37, %v324_v40  ;;  %v431_v17 = vmul.f32 %v429_v44, %v427_v8  ;;  %v529_v37 = vsel %vm1355_vm8, %v525_v59, 0.0  ;;  %p956_p0 = por %p955_p12, %p954_p11 }
 0x1c4   : > { %v551_v44 = vstv %s1425_s18  ;;  %v585_v59 = vstv %s1431_s20 }
 0x1c5   : > { %v370_v62 = vadd.f32 %v368_v46, %v342_v52  ;;  %v441_v4 = vpop.permute.xlu1 %440  ;;  %v389_v6 = vadd.f32 %v387_v43, %v375_v49  ;;  %v533_v49 = vmul.f32 %v531_v30, %v529_v37  ;;  %p957_p1 = pnand %p956_p0, %p952_p7 }
 0x1c6   : > { %v446_v41 = vsel %vm327_vm9, %v441_v4, 0.0 }
 0x1c7   : > { %v376_v10 = vadd.f32 %v374_v54, %v370_v62  ;;  %v432_v12 = vadd.f32 %v430_v58, %v389_v6  ;;  %v450_v32 = vmul.f32 %v449_v7, %v446_v41  ;;  %v591_v6 = vstv %s1437_s26 }
 0x1c8   : > { %v586_v7 = vmul.f32 %v585_v59, %v582_v50  ;;  %v593_v48 = vmul.f32 %v591_v6, %v1238_v2 }
 0x1c9   : > { %v390_v16 = vadd.f32 %v388_v9, %v376_v10  ;;  %v438_v18 = vadd.f32 %v436_v1, %v432_v12  ;;  %v497_v19 = vpop.permute.xlu0 %496  ;;  %v599_v8 = vpop.permute.xlu2 %598  ;;  %v592_v12 = vmul.f32 %v591_v6, %v1233_v0 }
 0x1ca   : > { %v501_v47 = vsel %vm327_vm9, %v497_v19, 0.0 }
 0x1cb   : > { %v433_v53 = vadd.f32 %v431_v17, %v390_v16  ;;  %v452_v24 = vadd.f32 %v450_v32, %v438_v18  ;;  %v505_v39 = vmul.f32 %v503_v21, %v501_v47  ;;  %v605_v16 = vstv %s1447_s27 }
 0x1cc   : > { %v603_v17 = vsel %vm327_vm9, %v599_v8, 0.0 }
 0x1cd   : > { %v439_v27 = vadd.f32 %v437_v15, %v433_v53  ;;  %v486_v28 = vadd.f32 %v484_v5, %v452_v24  ;;  %v523_v29 = vpop.permute.xlu1 %522  ;;  %v607_v22 = vmul.f32 %v605_v16, %v603_v17 }
 0x1ce   : > { %v528_v20 = vsel %vm1355_vm8, %v523_v29, 0.0 }
 0x1cf   : > { %v453_v34 = vadd.f32 %v451_v26, %v439_v27  ;;  %v492_v35 = vadd.f32 %v490_v13, %v486_v28  ;;  %v532_v36 = vmul.f32 %v531_v30, %v528_v20 }
 0x1d1   : > { %v487_v38 = vadd.f32 %v485_v63, %v453_v34  ;;  %v506_v40 = vadd.f32 %v504_v25, %v492_v35  ;;  %v543_v43 = vpop.permute.xlu0 %542 }
 0x1d2   : > { %v548_v57 = vsel %vm327_vm9, %v543_v43, 0.0 }
 0x1d3   : > { %v493_v45 = vadd.f32 %v491_v3, %v487_v38  ;;  %v534_v46 = vadd.f32 %v532_v36, %v506_v40  ;;  %v552_v55 = vmul.f32 %v551_v44, %v548_v57 }
 0x1d5   : > { %v507_v52 = vadd.f32 %v505_v39, %v493_v45  ;;  %v540_v54 = vadd.f32 %v538_v42, %v534_v46  ;;  %v545_v58 = vpop.permute.xlu1 %544 }
 0x1d6   : > { %v549_v62 = vsel %vm327_vm9, %v545_v58, 0.0 }
 0x1d7   : > { %v535_v1 = vadd.f32 %v533_v49, %v507_v52  ;;  %v554_v4 = vadd.f32 %v552_v55, %v540_v54  ;;  %v553_v9 = vmul.f32 %v551_v44, %v549_v62 }
 0x1d9   : > { %v541_v41 = vadd.f32 %v539_v56, %v535_v1  ;;  %v579_v10 = vpop.permute.xlu0 %578  ;;  %v588_v32 = vadd.f32 %v586_v7, %v554_v4 }
 0x1da   : > { %v583_v51 = vsel %vm1355_vm8, %v579_v10, 0.0 }
 0x1db   : > { %v555_v13 = vadd.f32 %v553_v9, %v541_v41  ;;  %v587_v15 = vmul.f32 %v585_v59, %v583_v51  ;;  %v594_v14 = vadd.f32 %v592_v12, %v588_v32 }
 0x1dd   : > { %v589_v18 = vadd.f32 %v587_v15, %v555_v13  ;;  %v597_v19 = vpop.permute.xlu1 %596 }
 0x1de   : > { %v602_v21 = vsel %vm327_vm9, %v597_v19, 0.0 }
 0x1df   : > { %v595_v23 = vadd.f32 %v593_v48, %v589_v18  ;;  %v606_v0 = vmul.f32 %v605_v16, %v602_v21 }
 0x1e1   : > { %v609_v60 = vadd.f32 %v607_v22, %v595_v23  ;;  %v608_v61 = vadd.f32 %v606_v0, %v594_v14 }
 0x1e3   : > { %v792_v5 = vmul.f32 -1.442695, %v609_v60  ;;  %v791_v2 = vmul.f32 -1.442695, %v608_v61 }
 0x1e5   : > { %880 = vpow2.f32 %v792_v5 }
 0x1e6   : > { %882 = vpow2.f32 %v791_v2 }
 0x1eb   : > { %v881_v53 = vpop.eup %880 }
 0x1ec   : > { %v883_v24 = vpop.eup %882  ;;  %v617_v25 = vadd.f32 1.0, %v881_v53 }
 0x1ed   : > { %v616_v26 = vadd.f32 1.0, %v883_v24 }
 0x1ee   : > { %884 = vrcp.f32 %v617_v25  ;;  %v644_v20 = vand.u32 2147483648, %v617_v25  ;;  %v642_v34 = vand.u32 2147483647, %v617_v25  ;;  %vm638_vm12 = vweird.f32 %v617_v25 }
 0x1ef   : > { %886 = vrcp.f32 %v616_v26  ;;  %v629_v31 = vand.u32 2147483648, %v616_v26  ;;  %v627_v35 = vand.u32 2147483647, %v616_v26  ;;  %vm623_vm13 = vweird.f32 %v616_v26 }
 0x1f0   : > { %v645_v37 = vor.u32 1.1754944e-38, %v644_v20  ;;  %vm643_vm1 = vcmp.eq.f32.partialorder %v642_v34, 8.507059e+37 }
 0x1f1   : > { %v630_v38 = vor.u32 1.1754944e-38, %v629_v31  ;;  %vm628_vm2 = vcmp.eq.f32.partialorder %v627_v35, 8.507059e+37 }
 0x1f4   : > { %v885_v11 = vpop.eup %884 }
 0x1f5   : > { %v887_v27 = vpop.eup %886  ;;  %v634_v28 = vmul.f32 %v885_v11, %v617_v25  ;;  %vm639_vm10 = vweird.f32 %v885_v11 }
 0x1f6   : > { %v619_v29 = vmul.f32 %v887_v27, %v616_v26  ;;  %vm624_vm11 = vweird.f32 %v887_v27  ;;  %vm640_vm14 = vmor %vm638_vm12, %vm639_vm10 }
 0x1f7   : > { %v635_v63 = vsub.f32 1.0, %v634_v28  ;;  %vm625_vm15 = vmor %vm623_vm13, %vm624_vm11 }
 0x1f8   : > { %v620_v30 = vsub.f32 1.0, %v619_v29 }
 0x1f9   : > { %v636_v33 = vmul.f32 %v885_v11, %v635_v63 }
 0x1fa   : > { %v621_v3 = vmul.f32 %v887_v27, %v620_v30 }
 0x1fb   : > { %v637_v36 = vadd.f32 %v885_v11, %v636_v33 }
 0x1fc   : > { %v622_v47 = vadd.f32 %v887_v27, %v621_v3 }
 0x1fd   : > { %v641_v40 = vsel %vm640_vm14, %v885_v11, %v637_v36 }
 0x1fe   : > { %v626_v42 = vsel %vm625_vm15, %v887_v27, %v622_v47  ;;  %v646_v43 = vsel %vm643_vm1, %v645_v37, %v641_v40 }
 0x1ff   : > { %v631_v44 = vsel %vm628_vm2, %v630_v38, %v626_v42  ;;  %649 = vst.msk [vmem:[%s194_s16 + $0x8] sm:$0xff] %vm204_vm0, %v646_v43 }
 0x200   : > { %648 = vst.msk [vmem:[%s194_s16] sm:$0xff] %vm204_vm0, %v631_v44 }
 0x201   : > { %960 = shalt.err (!%p957_p1)
}
 0x202   : > { %s1027_s17 = smov 128   ;;  %s1028_s26 = smov 8  }
 0x203   : > { %806 = dma.vmem_to_hbm [thread:$0]  (%p1096_p8), %s664_s23, 256, %s666_s12, %s651_s24, %s1027_s17, %s1027_s17, %s1028_s26  }
 0x204 PF: > { %s680_s27 = sand.u32 1, %s999_s9   ;;  %p817_p2 = pnand %p766_p13, %p1100_p9 }
 0x205   : > { %s681_s5 = scalar_lea.sflag [#allocation6], %s680_s27 }
 0x206   : > { %p818_p4 = pneg %p817_p2 }
 0x208   : > { %994 = dma.done.wait (%p818_p4), %s681_s5, 256  }
 0x209   : > { %996 = vsyncadd (%p818_p4), %s681_s5, 4294967040  ;;  %s19_s14 = sadd.s32 1, %s1019_s14   ;;  %s1518_s9 = smov %s1003_s10 }
 0x20a   : > { %p16_p6 = scmp.ge.s32.totalorder %s19_s14, 4   ;;  %s1519_s10 = smov %s1007_s11 }
 0x20b   : > { %s1520_s11 = smov %s1138_s19  ;;  %s1521_s12 = smov %s1015_s13 }
 0x20c   : > { %s1522_s13 = smov %s1524_s28  ;;  %18 = sbr.rel (!%p16_p6) target bundleno = 7 (0x7), region = 90 }
 0x211   :  { %687 = vsyncpa [#allocation5], 1 }
 0x212   :  { %689 = vsyncpa [#allocation5 + $0x1], 1 }
 0x213   :  { %690 = vsyncpa [#allocation6], 1 }
 0x214   :  { %692 = vsyncpa [#allocation6 + $0x1], 1 }
 0x215   :  { %693 = vsyncpa [#allocation7], 1 }
 0x216   :  { %695 = vsyncpa [#allocation7 + $0x1], 1 }

</bundles_post_ra>
